<compile_context>
chip_gen: v6e
topology: v6e:2x2x1
jax: 0.10.0
libtpu: 0.0.40
codegen_flags: <defaults>
</compile_context>

<pallas_src>
import jax
import jax.numpy as jnp
from jax.experimental import pallas as pl
from jax.experimental.pallas import tpu as pltpu


def _upsample_concat_kernel(x_ref, down_ref, ew_ref, eh_ref, o_ref):
    # x_ref:    (Cin,   H,  W)        one batch element, one input depth slice
    # down_ref: (Cdown, 2, 2H, 2W)    matching two output-depth slices of skip
    # ew_ref:   (W, 2W)               0/1 nearest-neighbour W-expansion matrix
    # eh_ref:   (2H, H)               0/1 nearest-neighbour H-expansion matrix
    # o_ref:    (Cin+Cdown, 2, 2H, 2W)
    cin, h, w = x_ref.shape
    ctot, _, two_h, two_w = o_ref.shape

    x = x_ref[...]                                        # (Cin, H, W)

    # Duplicate along W on the MXU: (Cin*H, W) @ (W, 2W).  Exact: weights are
    # 0/1 with a single nonzero per output column.
    y = jnp.dot(x.reshape(cin * h, w), ew_ref[...],
                preferred_element_type=jnp.float32)        # (Cin*H, 2W)
    y = y.reshape(cin, h, two_w)

    # Duplicate along H, batched over channels: (Cin, 2H, H) @ (Cin, H, 2W).
    eh = jnp.broadcast_to(eh_ref[...], (cin, two_h, h))
    z = jnp.einsum("cph,chw->cpw", eh, y,
                   preferred_element_type=jnp.float32)     # (Cin, 2H, 2W)
    z = z.astype(o_ref.dtype)

    # Duplicate along D: both output depth slices of this step get the slab.
    o_ref[0:cin, 0] = z
    o_ref[0:cin, 1] = z

    # Fused channel concat: copy the skip connection into the tail channels.
    o_ref[cin:ctot] = down_ref[...]


@jax.jit
def upsample_forward(inputs, down_outputs):
    """UpSample.forward: nearest 2x upsample of `inputs` + channel concat.

    inputs:        (N, Cin,   D,  H,  W)   NCDHW, like PyTorch
    down_outputs:  (N, Cdown, 2D, 2H, 2W)
    returns:       (N, Cin+Cdown, 2D, 2H, 2W)
    """
    n, cin, d, h, w = inputs.shape
    n2, cdown, d2, h2, w2 = down_outputs.shape
    assert (n2, d2, h2, w2) == (n, 2 * d, 2 * h, 2 * w), (inputs.shape,
                                                          down_outputs.shape)
    ctot = cin + cdown
    dtype = inputs.dtype

    # Exact 0/1 nearest-neighbour expansion matrices (out index -> in index//2).
    ew = (jnp.arange(2 * w)[None, :] // 2
          == jnp.arange(w)[:, None]).astype(dtype)          # (W, 2W)
    eh = (jnp.arange(2 * h)[:, None] // 2
          == jnp.arange(h)[None, :]).astype(dtype)          # (2H, H)

    return pl.pallas_call(
        _upsample_concat_kernel,
        out_shape=jax.ShapeDtypeStruct((n, ctot, 2 * d, 2 * h, 2 * w), dtype),
        grid_spec=pltpu.PrefetchScalarGridSpec(
            num_scalar_prefetch=0,
            grid=(n, d),
            in_specs=[
                # One input depth slice per step (batch & depth dims squeezed).
                pl.BlockSpec((None, cin, None, h, w),
                             lambda b, k: (b, 0, k, 0, 0)),
                # The two matching output-depth slices of the skip tensor.
                pl.BlockSpec((None, cdown, 2, 2 * h, 2 * w),
                             lambda b, k: (b, 0, k, 0, 0)),
                # Tiny expansion matrices, same block every step.
                pl.BlockSpec((w, 2 * w), lambda b, k: (0, 0)),
                pl.BlockSpec((2 * h, h), lambda b, k: (0, 0)),
            ],
            out_specs=pl.BlockSpec((None, ctot, 2, 2 * h, 2 * w),
                                   lambda b, k: (b, 0, k, 0, 0)),
        ),
        compiler_params=pltpu.CompilerParams(
            dimension_semantics=("parallel", "parallel")),
    )(inputs, down_outputs, ew, eh)


def _reference_forward(inputs, down_outputs):
    """Pure-JAX (XLA) reference for correctness checking."""
    up = inputs
    for ax in (2, 3, 4):
        up = jnp.repeat(up, 2, axis=ax)
    return jnp.concatenate([up, down_outputs], axis=1)


if __name__ == "__main__":
    # Small shapes: batch=2, inputs channels=4, skip channels=8, spatial 8^3.
    N, CIN, CDOWN, D, H, W = 2, 4, 8, 8, 8, 8

    key = jax.random.PRNGKey(0)
    k_in, k_down = jax.random.split(key)
    inputs = jax.random.normal(k_in, (N, CIN, D, H, W), jnp.float32)
    down_outputs = jax.random.normal(
        k_down, (N, CDOWN, 2 * D, 2 * H, 2 * W), jnp.float32)

    out = jax.block_until_ready(upsample_forward(inputs, down_outputs))
    ref = jax.block_until_ready(_reference_forward(inputs, down_outputs))

    assert out.shape == (N, CIN + CDOWN, 2 * D, 2 * H, 2 * W), out.shape
    assert jnp.allclose(out, ref, rtol=1e-5, atol=1e-5), float(
        jnp.max(jnp.abs(out - ref)))
    print("KERNEL_OK")
</pallas_src>

<mosaic_0001>
module attributes {stable_mosaic.version = 11 : i64} {
  func.func @_upsample_concat_kernel(%arg0: i32, %arg1: i32, %arg2: memref<1x4x1x8x8xf32, #tpu.memory_space<vmem>>, %arg3: memref<1x8x2x16x16xf32, #tpu.memory_space<vmem>>, %arg4: memref<8x16xf32, #tpu.memory_space<vmem>>, %arg5: memref<16x8xf32, #tpu.memory_space<vmem>>, %arg6: memref<1x12x2x16x16xf32, #tpu.memory_space<vmem>>) attributes {dimension_semantics = [#tpu.dimension_semantics<parallel>, #tpu.dimension_semantics<parallel>], iteration_bounds = array<i64: 2, 8>, scalar_prefetch = 0 : i64, scratch_operands = 0 : i64, tpu.core_type = #tpu.core_type<tc>, window_params = [{transform_indices = @transform_0, window_bounds = array<i64: 1, 4, 1, 8, 8>}, {transform_indices = @transform_1, window_bounds = array<i64: 1, 8, 2, 16, 16>}, {pipeline_mode = #tpu.pipeline_mode<synchronous>, transform_indices = @transform_2, window_bounds = array<i64: 8, 16>}, {pipeline_mode = #tpu.pipeline_mode<synchronous>, transform_indices = @transform_3, window_bounds = array<i64: 16, 8>}, {transform_indices = @transform_4, window_bounds = array<i64: 1, 12, 2, 16, 16>}]} {
    %c0 = arith.constant 0 : index
    %c0_0 = arith.constant 0 : index
    %c0_1 = arith.constant 0 : index
    %c0_2 = arith.constant 0 : index
    %c0_3 = arith.constant 0 : index
    %0 = vector.load %arg2[%c0, %c0_0, %c0_1, %c0_2, %c0_3] : memref<1x4x1x8x8xf32, #tpu.memory_space<vmem>>, vector<1x4x1x8x8xf32>
    %1 = vector.shape_cast %0 : vector<1x4x1x8x8xf32> to vector<4x8x8xf32>
    %2 = vector.shape_cast %1 : vector<4x8x8xf32> to vector<32x8xf32>
    %c0_4 = arith.constant 0 : index
    %c0_5 = arith.constant 0 : index
    %3 = vector.load %arg4[%c0_4, %c0_5] : memref<8x16xf32, #tpu.memory_space<vmem>>, vector<8x16xf32>
    %cst = arith.constant dense<0.000000e+00> : vector<32x16xf32>
    %4 = tpu.matmul %2, %3, %cst {dimension_numbers = #tpu.dot_dimension_numbers<[1], [0], [0], [1], [0, 0, 1, 1], [], []>} : vector<32x8xf32>, vector<8x16xf32>, vector<32x16xf32> -> vector<32x16xf32>
    %5 = vector.shape_cast %4 : vector<32x16xf32> to vector<4x8x16xf32>
    %c0_6 = arith.constant 0 : index
    %c0_7 = arith.constant 0 : index
    %6 = vector.load %arg5[%c0_6, %c0_7] : memref<16x8xf32, #tpu.memory_space<vmem>>, vector<16x8xf32>
    %7 = vector.shape_cast %6 : vector<16x8xf32> to vector<1x16x8xf32>
    %8 = vector.broadcast %7 : vector<1x16x8xf32> to vector<4x16x8xf32>
    "tpu.trace_start"() <{level = 10 : i32, message = "cph,chw->cpw"}> : () -> ()
    %cst_8 = arith.constant dense<0.000000e+00> : vector<4x16x16xf32>
    %9 = tpu.matmul %8, %5, %cst_8 {dimension_numbers = #tpu.dot_dimension_numbers<[2], [1], [1], [2], [0, 0, 0, 1, 1, 2], [0], [0]>} : vector<4x16x8xf32>, vector<4x8x16xf32>, vector<4x16x16xf32> -> vector<4x16x16xf32>
    "tpu.trace_stop"() : () -> ()
    %c0_9 = arith.constant 0 : index
    %c0_10 = arith.constant 0 : index
    %c0_11 = arith.constant 0 : index
    %c0_12 = arith.constant 0 : index
    %c0_13 = arith.constant 0 : index
    %10 = vector.load %arg6[%c0_9, %c0_10, %c0_11, %c0_12, %c0_13] : memref<1x12x2x16x16xf32, #tpu.memory_space<vmem>>, vector<1x4x1x16x16xf32>
    %11 = vector.shape_cast %10 : vector<1x4x1x16x16xf32> to vector<4x16x16xf32>
    %12 = vector.shape_cast %9 : vector<4x16x16xf32> to vector<1x4x1x16x16xf32>
    tpu.vector_store %arg6[%c0_9, %c0_10, %c0_11, %c0_12, %c0_13], %12 {strides = array<i32>} : memref<1x12x2x16x16xf32, #tpu.memory_space<vmem>>, vector<1x4x1x16x16xf32>,
    %c0_14 = arith.constant 0 : index
    %c0_15 = arith.constant 0 : index
    %c1 = arith.constant 1 : index
    %c0_16 = arith.constant 0 : index
    %c0_17 = arith.constant 0 : index
    %13 = vector.load %arg6[%c0_14, %c0_15, %c1, %c0_16, %c0_17] : memref<1x12x2x16x16xf32, #tpu.memory_space<vmem>>, vector<1x4x1x16x16xf32>
    %14 = vector.shape_cast %13 : vector<1x4x1x16x16xf32> to vector<4x16x16xf32>
    %15 = vector.shape_cast %9 : vector<4x16x16xf32> to vector<1x4x1x16x16xf32>
    tpu.vector_store %arg6[%c0_14, %c0_15, %c1, %c0_16, %c0_17], %15 {strides = array<i32>} : memref<1x12x2x16x16xf32, #tpu.memory_space<vmem>>, vector<1x4x1x16x16xf32>,
    %c0_18 = arith.constant 0 : index
    %c0_19 = arith.constant 0 : index
    %c0_20 = arith.constant 0 : index
    %c0_21 = arith.constant 0 : index
    %c0_22 = arith.constant 0 : index
    %16 = vector.load %arg3[%c0_18, %c0_19, %c0_20, %c0_21, %c0_22] : memref<1x8x2x16x16xf32, #tpu.memory_space<vmem>>, vector<1x8x2x16x16xf32>
    %17 = vector.shape_cast %16 : vector<1x8x2x16x16xf32> to vector<8x2x16x16xf32>
    %c0_23 = arith.constant 0 : index
    %c4 = arith.constant 4 : index
    %c0_24 = arith.constant 0 : index
    %c0_25 = arith.constant 0 : index
    %c0_26 = arith.constant 0 : index
    %18 = vector.load %arg6[%c0_23, %c4, %c0_24, %c0_25, %c0_26] : memref<1x12x2x16x16xf32, #tpu.memory_space<vmem>>, vector<1x8x2x16x16xf32>
    %19 = vector.shape_cast %18 : vector<1x8x2x16x16xf32> to vector<8x2x16x16xf32>
    %20 = vector.shape_cast %17 : vector<8x2x16x16xf32> to vector<1x8x2x16x16xf32>
    tpu.vector_store %arg6[%c0_23, %c4, %c0_24, %c0_25, %c0_26], %20 {strides = array<i32>} : memref<1x12x2x16x16xf32, #tpu.memory_space<vmem>>, vector<1x8x2x16x16xf32>,
    return
  }
  func.func @transform_0(%arg0: i32, %arg1: i32) -> (i32, i32, i32, i32, i32) {
    %c0_i32 = arith.constant 0 : i32
    %c0_i32_0 = arith.constant 0 : i32
    %c0_i32_1 = arith.constant 0 : i32
    %c0_i32_2 = arith.constant 0 : i32
    return %arg0, %c0_i32, %arg1, %c0_i32_0, %c0_i32_1 : i32, i32, i32, i32, i32
  }
  func.func @transform_1(%arg0: i32, %arg1: i32) -> (i32, i32, i32, i32, i32) {
    %c0_i32 = arith.constant 0 : i32
    %c0_i32_0 = arith.constant 0 : i32
    %c0_i32_1 = arith.constant 0 : i32
    %c0_i32_2 = arith.constant 0 : i32
    return %arg0, %c0_i32, %arg1, %c0_i32_0, %c0_i32_1 : i32, i32, i32, i32, i32
  }
  func.func @transform_2(%arg0: i32, %arg1: i32) -> (i32, i32) {
    %c0_i32 = arith.constant 0 : i32
    %c0_i32_0 = arith.constant 0 : i32
    %c0_i32_1 = arith.constant 0 : i32
    return %c0_i32, %c0_i32_0 : i32, i32
  }
  func.func @transform_3(%arg0: i32, %arg1: i32) -> (i32, i32) {
    %c0_i32 = arith.constant 0 : i32
    %c0_i32_0 = arith.constant 0 : i32
    %c0_i32_1 = arith.constant 0 : i32
    return %c0_i32, %c0_i32_0 : i32, i32
  }
  func.func @transform_4(%arg0: i32, %arg1: i32) -> (i32, i32, i32, i32, i32) {
    %c0_i32 = arith.constant 0 : i32
    %c0_i32_0 = arith.constant 0 : i32
    %c0_i32_1 = arith.constant 0 : i32
    %c0_i32_2 = arith.constant 0 : i32
    return %arg0, %c0_i32, %arg1, %c0_i32_0, %c0_i32_1 : i32, i32, i32, i32, i32
  }
}

</mosaic_0001>

<bundles_post_ra>
// kernel: upsample_forward.1
= control target key start
LH: loop header
LB: loop body
LE: loop exit
PB: predicated region body
PF: predicated region fallthrough
CT: control target
= control target key end

     0   :  { %9 = vsyncpa [#allocation3], 0  ;;  %s1661_s0 = inlined_call_operand.hbm [shape: f32[2,4,8,8,8], index: 0, kind: input, shape index: {}]   ;;  %s1662_s1 = inlined_call_operand.hbm [shape: f32[2,8,16,16,16], index: 1, kind: input, shape index: {}]   ;;  %s1663_s2 = inlined_call_operand.vmem [shape: f32[8,16], index: 2, kind: input, shape index: {}]   ;;  %s1664_s3 = inlined_call_operand.vmem [shape: f32[16,8], index: 3, kind: input, shape index: {}]   ;;  %s1665_s4 = inlined_call_operand.hbm [shape: f32[2,12,16,16,16], index: 4, kind: output, shape index: {}]  }
   0x1   :  { %11 = vsyncpa [#allocation3 + $0x1], 0 }
   0x2   :  { %12 = vsyncpa [#allocation6], 0 }
   0x3   :  { %14 = vsyncpa [#allocation6 + $0x1], 0 }
   0x4   :  { %15 = vsyncpa [#allocation4], 0 }
   0x5   :  { %17 = vsyncpa [#allocation4 + $0x1], 0  ;;  %s1325_s15 = smov 0   ;;  %s1327_s16 = smov 0  }
   0x6   :  { %s1329_s17 = smov 0   ;;  %s1331_s18 = smov 0  }
   0x7   :  { %s1333_s19 = smov 0   ;;  %s1335_s20 = smov 0  }
   0x8   :  { %s1337_s21 = smov 0   ;;  %s1339_s22 = smov 0  }
   0x9 LB: > { %1669 = sst [smem:[#allocation16_spill]] %s1261_s17  ;;  %s954_s23 = sadd.s32 4294967295, %s1281_s22   ;;  %s1281_s22 = sphi %s1339_s22, %s23_s22   ;;  %s1277_s21 = sphi %s1337_s21, %s1686_s21   ;;  %s1273_s20 = sphi %s1335_s20, %s1685_s20   ;;  %s1269_s19 = sphi %s1333_s19, %s1684_s19   ;;  %s1265_s18 = sphi %s1331_s18, %s1683_s18   ;;  %s1261_s17 = sphi %s1329_s17, %s1678_s17   ;;  %s1257_s16 = sphi %s1327_s16, %s1682_s16   ;;  %s1253_s15 = sphi %s1325_s15, %s1681_s15  }
   0xa   : > { %s955_s24 = sadd.s32 4294967294, %s1281_s22   ;;  %s32_s25 = sadd.s32 1, %s1273_s20 }
   0xb   : > { %p33_p0 = scmp.ge.s32.totalorder %s32_s25, 8  ;;  %s35_s26 = sadd.s32 1, %s1277_s21 }
   0xc   : > { %p51_p1 = scmp.ne.s32.totalorder %s1261_s17, %s1257_s16  ;;  %p52_p2 = scmp.eq.s32.totalorder %s1281_s22, 0 }
   0xd   : > { %s1688_s25 = smov (%p33_p0, %s32_s25), 0  ;;  %s1690_s26 = smov (!%p33_p0, %s35_s26), %s1277_s21 }
   0xe   : > { %1670 = sst [smem:[#allocation17_spill]] %s1688_s25  ;;  %s40_s27 = ssub.s32 %s1273_s20, %s1688_s25 }
   0xf   : > { %p1377_p3 = por %p52_p2, %p51_p1  ;;  %p37_p4 = scmp.ge.s32.totalorder %s1690_s26, 2 }
  0x10   : > { %p57_p5 = scmp.ne.s32.totalorder %s1257_s16, %s1253_s15  ;;  %p58_p6 = scmp.eq.s32.totalorder %s954_s23, 0 }
  0x11   : > { %p153_p7 = scmp.eq.s32.totalorder %s954_s23, 15  ;;  %s1692_s26 = smov (%p37_p4, %s1690_s26), 0 }
  0x12   : > { %1672 = sst [smem:[#allocation18_spill]] %s1692_s26  ;;  %p1385_p8 = por %p58_p6, %p57_p5 }
  0x13   : > { %p1389_p9 = por %p153_p7, %p51_p1  ;;  %s39_s5 = ssub.s32 %s1277_s21, %s1692_s26 }
  0x14   : > { %p159_p10 = scmp.eq.s32.totalorder %s955_s24, 15  ;;  %s41_s6 = sor.u32 %s40_s27, %s39_s5 }
  0x15   : > { %s44_s7 = sadd.s32 1, %s1261_s17  ;;  %p42_p11 = scmp.eq.s32.totalorder %s41_s6, 0 }
  0x16   : > { %p1396_p12 = por %p159_p10, %p57_p5  ;;  %p957_p13 = scmp.ge.s32.totalorder %s1281_s22, 16 }
  0x17   : > { %s1401_s9 = scalar_select %p42_p11, %s1261_s17, %s44_s7  }
  0x18   : > { %181 = sbr.rel (%p957_p13) target bundleno = 59 (0x3b), region = 24  ;;  %s1405_s10 = sand.u32 (!%p957_p13), 1, %s1261_s17  }
  0x19   : > { %1676 = sst [smem:[#allocation19_spill]] %s1401_s9  ;;  %s959_s11 = sshll.u32 (!%p957_p13), %s1277_s21, 5 }
  0x1a   : > { %s958_s12 = sshll.u32 (!%p957_p13), %s1405_s10, 5  ;;  %s194_s13 = sadd.s32 (!%p957_p13), %s1273_s20, %s959_s11 }
  0x1b   : > { %s960_s14 = sshll.u32 (!%p957_p13), %s194_s13, 7  ;;  %s189_s23 = scalar_lea.vmem (!%p957_p13), [#allocation2], %s958_s12 }
  0x1c   : > { %s197_s24 = sshll.u32 (!%p957_p13), %s189_s23, 4  ;;  %s196_s6 = scalar_lea.hbm (!%p957_p13), %s1661_s0, %s960_s14  ;;  %s198_s24 = int_to_ptr.vmem [resolvable:$true] %s197_s24 }
  0x1d   : > { %s186_s7 = scalar_lea.sflag [#allocation3], %s1405_s10  ;;  %s1193_s26 = scalar_lea.vmem %s198_s24, 512 }
  0x1e   : > { %p1194_p0 = scmp.ne.s32.totalorder %s198_s24, %s1193_s26  ;;  %s1283_s25 = smov [#allocation2]  }
  0x1f   : > { %s1197_s9 = sshll.u32 %s1283_s25, 4  ;;  %s1198_s9 = int_to_ptr.vmem [resolvable:$false] %s1197_s9 }
  0x20   : > { %p1195_p1 = pnand %p1194_p0, %p1377_p3  ;;  %s1199_s17 = scalar_lea.vmem %s1198_s9, 1024 }
  0x21   : > { %p1200_p4 = scmp.lt.s32.totalorder %s198_s24, %s1198_s9  ;;  %p1201_p5 = scmp.lt.s32.totalorder %s1199_s17, %s1193_s26 }
  0x22   : > { %p1196_p2 = pneg %p1195_p1 }
  0x23   : > { %p1202_p6 = por %p1201_p5, %p1200_p4 }
  0x25   : > { %p1203_p7 = pnand %p1202_p6, %p1196_p2 }
  0x27   : > { %1206 = shalt.err (!%p1203_p7)
}
  0x28   : > { %s1284_s11 = smov 1024   ;;  %s1285_s12 = smov 128  }
  0x29   : > { %s1286_s13 = smov 8  }
  0x2a   : > { %1077 = dma.hbm_to_vmem [thread:$0]  (%p1377_p3), %s196_s6, 512, %s198_s24, %s186_s7, %s1284_s11, %s1285_s12, %s1286_s13  }
  0x2b   : > { %s961_s25 = sshll.u32 %s1405_s10, 8  ;;  %s1028_s14 = sshll.u32 %s1273_s20, 2 }
  0x2c   : > { %s964_s17 = sshll.u32 %s1277_s21, 8  ;;  %s211_s26 = scalar_lea.vmem [#allocation5], %s961_s25 }
  0x2d   : > { %s233_s9 = sshll.u32 %s211_s26, 4  ;;  %s218_s23 = sadd.s32 %s1028_s14, %s964_s17  ;;  %s234_s9 = int_to_ptr.vmem [resolvable:$true] %s233_s9 }
  0x2e   : > { %s1287_s27 = smov 4096   ;;  %s965_s6 = sshll.u32 %s218_s23, 7 }
  0x2f   : > { %1079 = sst [smem:[#allocation9]] (%p1377_p3), %s1287_s27  ;;  %s1288_s7 = smov 512  }
  0x30   : > { %s1078_s24 = scalar_select %p1377_p3, [#allocation0], [#allocation12] }
  0x31   : > { %1080 = sst [smem:[#allocation9 + $0x1]] (%p1377_p3), %s1288_s7  ;;  %s1289_s11 = smov 4  }
  0x32   : > { %s225_s5 = sld [smem:[%s1078_s24]]   ;;  %s1290_s12 = smov 128  }
  0x33   : > { %1081 = sst [smem:[#allocation9 + $0x2]] (%p1377_p3), %s1289_s11  ;;  %s220_s14 = scalar_lea.hbm %s1662_s1, %s965_s6 }
  0x34   : > { %1082 = sst [smem:[#allocation9 + $0x3]] (%p1377_p3), %s1290_s12  ;;  %s1291_s17 = smov 8  }
  0x35   : > { %1083 = sst [smem:[#allocation9 + $0x4]] (%p1377_p3), %s1290_s12  ;;  %s208_s27 = scalar_lea.sflag [#allocation6], %s1405_s10 }
  0x36   : > { %1084 = sst [smem:[#allocation9 + $0x5]] (%p1377_p3), %s1291_s17  ;;  %s1292_s24 = smov 131072  }
  0x38   : > { %s966_s26 = sshll.u32 %s225_s5, 26 }
  0x39   : > { %s967_s23 = sadd.s32 134217728, %s966_s26 }
  0x3a   : > { %1085 = dma.general (%p1377_p3), %s220_s14, 4096, %s234_s9, %s208_s27, %s1292_s24, [#allocation9], %s967_s23, 0  }
  0x3b PF: > { %p968_p10 = scmp.ge.s32.totalorder %s1281_s22, 1  ;;  %p254_p11 = scmp.lt.s32.totalorder %s1281_s22, 17 }
  0x3d   : > { %p255_p13 = pnand %p968_p10, %p254_p11 }
  0x3e   : > { %s1444_s6 = sand.u32 (!%p255_p13), 1, %s1257_s16  }
  0x3f   : > { %258 = sbr.rel (%p255_p13) target bundleno = 487 (0x1e7), region = 36  ;;  %s969_s7 = sshll.u32 (!%p255_p13), %s1444_s6, 5 }
  0x40   : > { %s261_s5 = scalar_lea.sflag (!%p255_p13), [#allocation3], %s1444_s6  ;;  %s264_s11 = scalar_lea.vmem (!%p255_p13), [#allocation2], %s969_s7 }
  0x44   : > { %1240 = dma.done.wait (%p1385_p8), %s261_s5, 512  }
  0x45   : > { %1242 = vsyncadd (%p1385_p8), %s261_s5, 4294966784  ;;  %s970_s28 = sshll.u32 %s1444_s6, 8  ;;  %s270_s10 = scalar_lea.sflag [#allocation6], %s1444_s6 }
  0x46   : > { %s1454_s9 = scalar_lea.vmem [#allocation5], %s970_s28 }
  0x47   : > { %1244 = dma.done.wait (%p1385_p8), %s270_s10, 4096  }
  0x48   : > { %1246 = vsyncadd (%p1385_p8), %s270_s10, 4294963200  ;;  %vm310_vm0 = vcmask 64512   ;;  %v309_v0 = vld [vmem:[%s1663_s2] sm:$0xff]  ;;  %v306_v2 = vld [vmem:[%s264_s11 + $0x8] sm:$0xff]  ;;  %s1075_s26 = smul.u32 384, %s1444_s6  ;;  %vm716_vm1 = vcmask 130048  }
  0x49   : > { %v305_v1 = vld [vmem:[%s264_s11] sm:$0xff]  ;;  %1047 = vmatprep.subr.mxu0 %v309_v0  ;;  %v307_v3 = vld [vmem:[%s264_s11 + $0x10] sm:$0xff]  ;;  %v308_v4 = vld [vmem:[%s264_s11 + $0x18] sm:$0xff]  ;;  %s800_s27 = scalar_lea.sflag [#allocation4], %s1444_s6 }
  0x4a   : > { %1049 = vmatprep.mubr.msk.f32.mxu0 %vm310_vm0, %v305_v1  ;;  %1048 = vmatpush3.msra.mxu0 %v309_v0  ;;  %v408_v5 = vld [vmem:[%s1664_s3] sm:$0xff]  ;;  %v409_v8 = vld [vmem:[%s1664_s3 + $0x8] sm:$0xff]  ;;  %v736_v13 = vld [vmem:[%s1454_s9 + $0x10] sm:$0xff]  ;;  %s1488_s23 = scalar_lea.vmem [#allocation7], %s1075_s26 }
  0x4b   : > { %1050 = vmatmul.mubr.msk.f32.vlgmr.msra.gmra.mxu0 %vm310_vm0, %v306_v2  ;;  %1057 = vmatprep.mubr.msk.f32.mxu1 %vm310_vm0, %v408_v5  ;;  %v734_v11 = vld [vmem:[%s1454_s9] sm:$0xff]  ;;  %v735_v12 = vld [vmem:[%s1454_s9 + $0x8] sm:$0xff]  ;;  %v737_v14 = vld [vmem:[%s1454_s9 + $0x18] sm:$0xff]  ;;  %993 = vst.msk [vmem:[%s1488_s23 + $0x90] sm:$0xff] %vm716_vm1, %v736_v13 }
  0x4c   : > { %1052 = vmatprep.mubr.msk.f32.mxu0 %vm310_vm0, %v307_v3  ;;  %v738_v15 = vld [vmem:[%s1454_s9 + $0x20] sm:$0xff]  ;;  %v739_v16 = vld [vmem:[%s1454_s9 + $0x28] sm:$0xff]  ;;  %991 = vst.msk [vmem:[%s1488_s23 + $0x80] sm:$0xff] %vm716_vm1, %v734_v11  ;;  %992 = vst.msk [vmem:[%s1488_s23 + $0x88] sm:$0xff] %vm716_vm1, %v735_v12 }
  0x4d   : > { %v740_v17 = vld [vmem:[%s1454_s9 + $0x30] sm:$0xff]  ;;  %v741_v18 = vld [vmem:[%s1454_s9 + $0x38] sm:$0xff]  ;;  %v742_v19 = vld [vmem:[%s1454_s9 + $0x40] sm:$0xff]  ;;  %994 = vst.msk [vmem:[%s1488_s23 + $0x98] sm:$0xff] %vm716_vm1, %v737_v14 }
  0x4e   : > { %995 = vst.msk [vmem:[%s1488_s23 + $0xa0] sm:$0xff] %vm716_vm1, %v738_v15  ;;  %996 = vst.msk [vmem:[%s1488_s23 + $0xa8] sm:$0xff] %vm716_vm1, %v739_v16  ;;  %v743_v20 = vld [vmem:[%s1454_s9 + $0x48] sm:$0xff]  ;;  %v744_v21 = vld [vmem:[%s1454_s9 + $0x50] sm:$0xff] }
  0x4f   : > { %1053 = vmatmul.mubr.msk.f32.gmra.mxu0 %vm310_vm0, %v308_v4  ;;  %v745_v22 = vld [vmem:[%s1454_s9 + $0x58] sm:$0xff]  ;;  %997 = vst.msk [vmem:[%s1488_s23 + $0xb0] sm:$0xff] %vm716_vm1, %v740_v17  ;;  %998 = vst.msk [vmem:[%s1488_s23 + $0xb8] sm:$0xff] %vm716_vm1, %v741_v18  ;;  %v746_v23 = vld [vmem:[%s1454_s9 + $0x60] sm:$0xff] }
  0x50   : > { %1067 = vmatprep.mubr.msk.f32.mxu0 %vm310_vm0, %v408_v5  ;;  %999 = vst.msk [vmem:[%s1488_s23 + $0xc0] sm:$0xff] %vm716_vm1, %v742_v19  ;;  %v747_v24 = vld [vmem:[%s1454_s9 + $0x68] sm:$0xff]  ;;  %v748_v25 = vld [vmem:[%s1454_s9 + $0x70] sm:$0xff]  ;;  %1000 = vst.msk [vmem:[%s1488_s23 + $0xc8] sm:$0xff] %vm716_vm1, %v743_v20 }
  0x51   : > { %1001 = vst.msk [vmem:[%s1488_s23 + $0xd0] sm:$0xff] %vm716_vm1, %v744_v21  ;;  %1002 = vst.msk [vmem:[%s1488_s23 + $0xd8] sm:$0xff] %vm716_vm1, %v745_v22  ;;  %v749_v26 = vld [vmem:[%s1454_s9 + $0x78] sm:$0xff]  ;;  %v750_v27 = vld [vmem:[%s1454_s9 + $0x80] sm:$0xff] }
  0x52   : > { %v751_v28 = vld [vmem:[%s1454_s9 + $0x88] sm:$0xff]  ;;  %1003 = vst.msk [vmem:[%s1488_s23 + $0xe0] sm:$0xff] %vm716_vm1, %v746_v23  ;;  %1004 = vst.msk [vmem:[%s1488_s23 + $0xe8] sm:$0xff] %vm716_vm1, %v747_v24  ;;  %v752_v29 = vld [vmem:[%s1454_s9 + $0x90] sm:$0xff] }
  0x53   : > { %1005 = vst.msk [vmem:[%s1488_s23 + $0xf0] sm:$0xff] %vm716_vm1, %v748_v25  ;;  %v753_v30 = vld [vmem:[%s1454_s9 + $0x98] sm:$0xff]  ;;  %v754_v31 = vld [vmem:[%s1454_s9 + $0xa0] sm:$0xff]  ;;  %1006 = vst.msk [vmem:[%s1488_s23 + $0xf8] sm:$0xff] %vm716_vm1, %v749_v26 }
  0x54   : > { %1007 = vst.msk [vmem:[%s1488_s23 + $0x100] sm:$0xff] %vm716_vm1, %v750_v27  ;;  %1008 = vst.msk [vmem:[%s1488_s23 + $0x108] sm:$0xff] %vm716_vm1, %v751_v28  ;;  %v755_v32 = vld [vmem:[%s1454_s9 + $0xa8] sm:$0xff]  ;;  %v756_v33 = vld [vmem:[%s1454_s9 + $0xb0] sm:$0xff] }
  0x55   : > { %v757_v34 = vld [vmem:[%s1454_s9 + $0xb8] sm:$0xff]  ;;  %1009 = vst.msk [vmem:[%s1488_s23 + $0x110] sm:$0xff] %vm716_vm1, %v752_v29  ;;  %1010 = vst.msk [vmem:[%s1488_s23 + $0x118] sm:$0xff] %vm716_vm1, %v753_v30  ;;  %v758_v35 = vld [vmem:[%s1454_s9 + $0xc0] sm:$0xff] }
  0x56   : > { %1011 = vst.msk [vmem:[%s1488_s23 + $0x120] sm:$0xff] %vm716_vm1, %v754_v31  ;;  %v759_v36 = vld [vmem:[%s1454_s9 + $0xc8] sm:$0xff]  ;;  %v760_v37 = vld [vmem:[%s1454_s9 + $0xd0] sm:$0xff]  ;;  %1012 = vst.msk [vmem:[%s1488_s23 + $0x128] sm:$0xff] %vm716_vm1, %v755_v32 }
  0x57   : > { %1013 = vst.msk [vmem:[%s1488_s23 + $0x130] sm:$0xff] %vm716_vm1, %v756_v33  ;;  %1014 = vst.msk [vmem:[%s1488_s23 + $0x138] sm:$0xff] %vm716_vm1, %v757_v34  ;;  %v761_v38 = vld [vmem:[%s1454_s9 + $0xd8] sm:$0xff]  ;;  %v762_v39 = vld [vmem:[%s1454_s9 + $0xe0] sm:$0xff] }
  0x58   : > { %v763_v40 = vld [vmem:[%s1454_s9 + $0xe8] sm:$0xff]  ;;  %1015 = vst.msk [vmem:[%s1488_s23 + $0x140] sm:$0xff] %vm716_vm1, %v758_v35  ;;  %1016 = vst.msk [vmem:[%s1488_s23 + $0x148] sm:$0xff] %vm716_vm1, %v759_v36  ;;  %v764_v41 = vld [vmem:[%s1454_s9 + $0xf0] sm:$0xff] }
  0x59   : > { %1017 = vst.msk [vmem:[%s1488_s23 + $0x150] sm:$0xff] %vm716_vm1, %v760_v37  ;;  %v765_v42 = vld [vmem:[%s1454_s9 + $0xf8] sm:$0xff]  ;;  %1018 = vst.msk [vmem:[%s1488_s23 + $0x158] sm:$0xff] %vm716_vm1, %v761_v38 }
  0x5a   : > { %1019 = vst.msk [vmem:[%s1488_s23 + $0x160] sm:$0xff] %vm716_vm1, %v762_v39  ;;  %1020 = vst.msk [vmem:[%s1488_s23 + $0x168] sm:$0xff] %vm716_vm1, %v763_v40 }
  0x5b   : > { %1021 = vst.msk [vmem:[%s1488_s23 + $0x170] sm:$0xff] %vm716_vm1, %v764_v41  ;;  %1022 = vst.msk [vmem:[%s1488_s23 + $0x178] sm:$0xff] %vm716_vm1, %v765_v42 }
 0x10b   : > { %v1051_v6 = vpop.f32.mrf.mxu0 }
 0x10d   : > { %v389_v7 = vpop.f32.mrf.mxu0 }
 0x10e   : > { %1055 = vmatprep.subr.mxu1 %v389_v7 }
 0x10f   : > { %v1054_v9 = vpop.f32.mrf.mxu0  ;;  %1056 = vmatpush3.msra.mxu1 %v389_v7 }
 0x110   : > { %1058 = vmatmul.mubr.msk.f32.vlgmr.msra.gmra.mxu1 %vm310_vm0, %v409_v8  ;;  %1060 = vmatprep.subr.mxu1 %v1051_v6 }
 0x111   : > { %v399_v10 = vpop.f32.mrf.mxu0  ;;  %1061 = vmatpush3.msra.mxu1 %v1051_v6  ;;  %1062 = vmatprep.mubr.msk.f32.mxu1 %vm310_vm0, %v408_v5 }
 0x112   : > { %1065 = vmatprep.subr.mxu0 %v399_v10  ;;  %1070 = vmatprep.subr.mxu1 %v1054_v9 }
 0x113   : > { %1066 = vmatpush3.msra.mxu0 %v399_v10 }
 0x114   : > { %1063 = vmatmul.mubr.msk.f32.vlgmr.msra.gmra.mxu1 %vm310_vm0, %v409_v8  ;;  %1068 = vmatmul.mubr.msk.f32.vlgmr.msra.gmra.mxu0 %vm310_vm0, %v409_v8 }
 0x115   : > { %1071 = vmatpush3.msra.mxu1 %v1054_v9  ;;  %1072 = vmatprep.mubr.msk.f32.mxu1 %vm310_vm0, %v408_v5 }
 0x118   : > { %1073 = vmatmul.mubr.msk.f32.vlgmr.msra.gmra.mxu1 %vm310_vm0, %v409_v8 }
 0x1d0   : > { %v1059_v43 = vpop.f32.mrf.mxu1 }
 0x1d1   : > { %718 = vst.msk [vmem:[%s1488_s23 + $0x8] sm:$0xff] %vm716_vm1, %v1059_v43  ;;  %984 = vst.msk [vmem:[%s1488_s23 + $0x18] sm:$0xff] %vm716_vm1, %v1059_v43 }
 0x1d2   : > { %v482_v44 = vpop.f32.mrf.mxu1 }
 0x1d3   : > { %717 = vst.msk [vmem:[%s1488_s23] sm:$0xff] %vm716_vm1, %v482_v44  ;;  %983 = vst.msk [vmem:[%s1488_s23 + $0x10] sm:$0xff] %vm716_vm1, %v482_v44 }
 0x1d4   : > { %v1064_v45 = vpop.f32.mrf.mxu1  ;;  %v1069_v46 = vpop.f32.mrf.mxu0 }
 0x1d5   : > { %720 = vst.msk [vmem:[%s1488_s23 + $0x28] sm:$0xff] %vm716_vm1, %v1064_v45  ;;  %986 = vst.msk [vmem:[%s1488_s23 + $0x38] sm:$0xff] %vm716_vm1, %v1064_v45 }
 0x1d6   : > { %722 = vst.msk [vmem:[%s1488_s23 + $0x48] sm:$0xff] %vm716_vm1, %v1069_v46  ;;  %988 = vst.msk [vmem:[%s1488_s23 + $0x58] sm:$0xff] %vm716_vm1, %v1069_v46  ;;  %v557_v47 = vpop.f32.mrf.mxu1  ;;  %v632_v48 = vpop.f32.mrf.mxu0 }
 0x1d7   : > { %719 = vst.msk [vmem:[%s1488_s23 + $0x20] sm:$0xff] %vm716_vm1, %v557_v47  ;;  %985 = vst.msk [vmem:[%s1488_s23 + $0x30] sm:$0xff] %vm716_vm1, %v557_v47 }
 0x1d8   : > { %721 = vst.msk [vmem:[%s1488_s23 + $0x40] sm:$0xff] %vm716_vm1, %v632_v48  ;;  %987 = vst.msk [vmem:[%s1488_s23 + $0x50] sm:$0xff] %vm716_vm1, %v632_v48  ;;  %v1074_v49 = vpop.f32.mrf.mxu1 }
 0x1d9   : > { %724 = vst.msk [vmem:[%s1488_s23 + $0x68] sm:$0xff] %vm716_vm1, %v1074_v49  ;;  %990 = vst.msk [vmem:[%s1488_s23 + $0x78] sm:$0xff] %vm716_vm1, %v1074_v49 }
 0x1da   : > { %v707_v50 = vpop.f32.mrf.mxu1 }
 0x1db   : > { %723 = vst.msk [vmem:[%s1488_s23 + $0x60] sm:$0xff] %vm716_vm1, %v707_v50  ;;  %989 = vst.msk [vmem:[%s1488_s23 + $0x70] sm:$0xff] %vm716_vm1, %v707_v50 }
 0x1dc   : > { %s1029_s24 = sshll.u32 %s1265_s18, 2  ;;  %s1076_s7 = smul.u32 384, %s1269_s19 }
 0x1dd   : > { %s826_s5 = sshll.u32 %s1488_s23, 4  ;;  %s1293_s10 = smov 512   ;;  %s827_s5 = int_to_ptr.vmem [resolvable:$true] %s826_s5 }
 0x1de   : > { %s813_s11 = sadd.s32 %s1076_s7, %s1029_s24  ;;  %1088 = sst [smem:[#allocation11]] (%p1389_p9), %s1293_s10 }
 0x1df   : > { %s1025_s28 = sshll.u32 %s813_s11, 7  ;;  %s1294_s13 = smov 4096  }
 0x1e0   : > { %s815_s12 = scalar_lea.hbm %s1665_s4, %s1025_s28  ;;  %1089 = sst [smem:[#allocation11 + $0x1]] (%p1389_p9), %s1294_s13 }
 0x1e1   : > { %s1295_s29 = smov 4   ;;  %s1296_s18 = smov 128  }
 0x1e2   : > { %1090 = sst [smem:[#allocation11 + $0x2]] (%p1389_p9), %s1295_s29  ;;  %s1297_s19 = smov 8  }
 0x1e3   : > { %1091 = sst [smem:[#allocation11 + $0x3]] (%p1389_p9), %s1296_s18  ;;  %s1298_s25 = smov 131072  }
 0x1e4   : > { %1092 = sst [smem:[#allocation11 + $0x4]] (%p1389_p9), %s1296_s18  ;;  %s1299_s14 = smov 0  }
 0x1e5   : > { %1093 = sst [smem:[#allocation11 + $0x5]] (%p1389_p9), %s1297_s19 }
 0x1e6   : > { %1094 = dma.general (%p1389_p9), %s827_s5, 6144, %s815_s12, %s800_s27, %s1298_s25, [#allocation11], %s1299_s14, 0  }
 0x1e7 PF: > { %p1100_p3 = scmp.ge.s32.totalorder %s1281_s22, 2  ;;  %s854_s17 = sand.u32 1, %s1253_s15  }
 0x1e8   : > { %s855_s26 = scalar_lea.sflag [#allocation4], %s854_s17 }
 0x1e9   : > { %p1097_p8 = pnand %p1100_p3, %p1396_p12 }
 0x1eb   : > { %p1098_p0 = pneg %p1097_p8 }
 0x1ed   : > { %1248 = dma.done.wait (%p1098_p0), %s855_s26, 6144  }
 0x1ee   : > { %1250 = vsyncadd (%p1098_p0), %s855_s26, 4294961152  ;;  %s23_s22 = sadd.s32 1, %s1281_s22   ;;  %s1677_s23 = sld [smem:[#allocation16_spill]] }
 0x1ef   : > { %p20_p1 = scmp.ge.s32.totalorder %s23_s22, 18   ;;  %s1678_s17 = sld [smem:[#allocation19_spill]] }
 0x1f0   : > { %s1679_s30 = sld [smem:[#allocation17_spill]]  ;;  %s1681_s15 = smov %s1257_s16 }
 0x1f1   : > { %s1680_s27 = sld [smem:[#allocation18_spill]]  ;;  %s1683_s18 = smov %s1273_s20 }
 0x1f2   : > { %s1684_s19 = smov %s1277_s21 }
 0x1f3   :  { %22 = sbr.rel (!%p20_p1) target bundleno = 9 (0x9), region = 106 }
 0x1f4   : > { %s1682_s16 = smov %s1677_s23 }
 0x1f6   : > { %s1685_s20 = smov %s1679_s30 }
 0x1f7   : > { %s1686_s21 = smov %s1680_s27 }
 0x1f8   :  { %860 = vsyncpa [#allocation3], 1 }
 0x1f9   :  { %862 = vsyncpa [#allocation3 + $0x1], 1 }
 0x1fa   :  { %863 = vsyncpa [#allocation6], 1 }
 0x1fb   :  { %865 = vsyncpa [#allocation6 + $0x1], 1 }
 0x1fc   :  { %866 = vsyncpa [#allocation4], 1 }
 0x1fd   :  { %868 = vsyncpa [#allocation4 + $0x1], 1 }

</bundles_post_ra>
